<compile_context>
chip_gen: v7x
topology: tpu7x:2x2x1
jax: 0.10.0
libtpu: 0.0.40
codegen_flags: <defaults>
</compile_context>

<pallas_src>
import numpy as np
import jax
import jax.numpy as jnp
from jax.experimental import pallas as pl
from jax.experimental.pallas import tpu as pltpu

_LANE = 128


def _round_up(a, b):
    return (a + b - 1) // b * b


# ----------------------------------------------------------------------------
# Kernel factory: one grid step processes TT time steps of a (ts, 128) tile.
# Grid = (s_tiles, t_blocks); time is the innermost ("arbitrary") axis so the
# f32 VMEM scratch carries h across time blocks of the same (s) tile.
# ----------------------------------------------------------------------------
def _make_kernel(TT, time_unroll, has_h0):
    def kernel(*refs):
        if has_h0:
            h0_ref, f_ref, x_ref, o_ref, carry_ref = refs
        else:
            f_ref, x_ref, o_ref, carry_ref = refs

        # (Re)initialize the carry at the start of every tile's time loop.
        @pl.when(pl.program_id(1) == 0)
        def _init():
            if has_h0:
                carry_ref[...] = h0_ref[...].astype(jnp.float32)
            else:
                carry_ref[...] = jnp.zeros_like(carry_ref)

        def time_body(tt, h):
            fv = f_ref[tt].astype(jnp.float32)       # (ts, 128)
            xv = x_ref[tt].astype(jnp.float32)       # (ts, 128)
            h = fv * xv + (1.0 - fv) * h             # same formula as reference
            o_ref[tt] = h.astype(o_ref.dtype)
            return h

        # Carry h in vregs across all TT steps; touch the VMEM scratch only
        # once per grid step (load as init, store at the end).
        h_final = jax.lax.fori_loop(0, TT, time_body, carry_ref[...],
                                    unroll=time_unroll)
        carry_ref[...] = h_final

    return kernel


def forget_mult_pallas(f, x, hidden_init=None):
    assert f.ndim == 3 and f.shape == x.shape, "expected (T, B, H) inputs"
    T, B, H = f.shape
    N = B * H
    has_h0 = hidden_init is not None
    if has_h0:
        assert hidden_init.shape == (B, H)
        out_dtype = jnp.result_type(f.dtype, x.dtype, hidden_init.dtype)
    else:
        out_dtype = jnp.result_type(f.dtype, x.dtype)

    # ---- normalize to a lane-dense (T, S, 128) problem ----------------------
    Np = _round_up(N, _LANE)
    pad = Np - N
    f2 = f.reshape(T, N)
    x2 = x.reshape(T, N)
    if pad:
        # TODO(synk): pad is an extra HBM copy; only hit when B*H % 128 != 0.
        f2 = jnp.pad(f2, ((0, 0), (0, pad)))
        x2 = jnp.pad(x2, ((0, 0), (0, pad)))
    S = Np // _LANE
    f3 = f2.reshape(T, S, _LANE)
    x3 = x2.reshape(T, S, _LANE)
    if has_h0:
        h2 = hidden_init.reshape(1, N)
        if pad:
            h2 = jnp.pad(h2, ((0, 0), (0, pad)))
        h3 = h2.reshape(S, _LANE)

    # ---- tile selection ------------------------------------------------------
    # Sublane tile: multiple of 8 (or full extent), capped so the in-vreg carry
    # stays small (ts*128 f32 <= 4 vregs).  If everything would collapse to one
    # tile, split so >= 2 parallel tiles exist (v7x megacore).
    if S <= 8:
        ts = S
    else:
        ts = min(_round_up(S, 8), 32)
        if ts >= S and S >= 16:
            ts = _round_up(pl.cdiv(S, 2), 8)
    grid_s = pl.cdiv(S, ts)

    in_bytes = np.dtype(f.dtype).itemsize + np.dtype(x.dtype).itemsize
    out_bytes = np.dtype(out_dtype).itemsize
    row_bytes = ts * _LANE * (in_bytes + out_bytes)      # f + x + out, one step
    io_budget = 16 * 1024 * 1024                         # double-buffered slabs
    TT = max(1, min(T, io_budget // (2 * row_bytes), 256))
    grid_t = pl.cdiv(T, TT)
    time_unroll = min(TT, 8)

    grid = (grid_s, grid_t)
    kernel = _make_kernel(TT, time_unroll, has_h0)

    fx_spec = pl.BlockSpec((TT, ts, _LANE), lambda s, t: (t, s, 0))
    in_specs = [fx_spec, fx_spec]
    args = [f3, x3]
    if has_h0:
        in_specs = [pl.BlockSpec((ts, _LANE), lambda s, t: (s, 0))] + in_specs
        args = [h3] + args

    elem = T * N
    bytes_accessed = (f.size * f.dtype.itemsize + x.size * x.dtype.itemsize
                      + elem * out_bytes)
    if has_h0:
        bytes_accessed += N * np.dtype(hidden_init.dtype).itemsize
    cost = pl.CostEstimate(flops=4 * elem, transcendentals=0,
                           bytes_accessed=bytes_accessed)

    out3 = pl.pallas_call(
        kernel,
        out_shape=jax.ShapeDtypeStruct((T, S, _LANE), out_dtype),
        grid_spec=pltpu.PrefetchScalarGridSpec(
            num_scalar_prefetch=0,
            grid=grid,
            in_specs=in_specs,
            out_specs=pl.BlockSpec((TT, ts, _LANE), lambda s, t: (t, s, 0)),
            scratch_shapes=[pltpu.VMEM((ts, _LANE), jnp.float32)],   # carry
        ),
        compiler_params=pltpu.CompilerParams(
            dimension_semantics=("parallel", "arbitrary"),
            vmem_limit_bytes=40 * 1024 * 1024,
        ),
        cost_estimate=cost,
    )(*args)

    out = out3.reshape(T, Np)
    if pad:
        out = out[:, :N]
    return out.reshape(T, B, H)


# ----------------------------------------------------------------------------
# Module-style wrapper mirroring the PyTorch CPUForgetMult forward.
# ----------------------------------------------------------------------------
class CPUForgetMult:
    def __call__(self, f, x, hidden_init=None):
        return forget_mult_pallas(f, x, hidden_init)


# ----------------------------------------------------------------------------
# Pure-JAX reference (lax.scan) for correctness check.
# ----------------------------------------------------------------------------
def forget_mult_ref(f, x, hidden_init=None):
    T, B, H = f.shape
    h0 = (jnp.zeros((B, H), jnp.float32) if hidden_init is None
          else hidden_init.astype(jnp.float32))

    def step(prev_h, ft_xt):
        ft, xt = ft_xt
        h = ft * xt + (1.0 - ft) * prev_h
        return h, h

    _, hs = jax.lax.scan(step, h0,
                         (f.astype(jnp.float32), x.astype(jnp.float32)))
    return hs


if __name__ == "__main__":
    fm = CPUForgetMult()
    key = jax.random.PRNGKey(0)

    # Case 1/2: small shapes consistent with the module (seq=8, batch=2,
    # hidden=32) -- exercises the lane-padding path (B*H = 64 < 128).
    T, B, H = 8, 2, 32
    kf, kx, kh, k2 = jax.random.split(key, 4)
    f = jax.nn.sigmoid(jax.random.normal(kf, (T, B, H), dtype=jnp.float32))
    x = jax.random.normal(kx, (T, B, H), dtype=jnp.float32)
    h0 = jax.random.normal(kh, (B, H), dtype=jnp.float32)

    out1 = jax.block_until_ready(fm(f, x))                 # prev_h is None branch
    ref1 = jax.block_until_ready(forget_mult_ref(f, x))
    assert out1.shape == (T, B, H)
    assert np.allclose(np.asarray(out1), np.asarray(ref1), rtol=1e-5, atol=1e-5), (
        np.abs(np.asarray(out1) - np.asarray(ref1)).max())

    out2 = jax.block_until_ready(fm(f, x, h0))             # explicit hidden_init
    ref2 = jax.block_until_ready(forget_mult_ref(f, x, h0))
    assert np.allclose(np.asarray(out2), np.asarray(ref2), rtol=1e-5, atol=1e-5), (
        np.abs(np.asarray(out2) - np.asarray(ref2)).max())

    # Case 3: larger shape exercising time-blocking (multiple time blocks with
    # a padded last block), multiple parallel sublane tiles, and hidden_init.
    T3, B3, H3 = 500, 8, 512
    kf3, kx3, kh3 = jax.random.split(k2, 3)
    f3 = jax.nn.sigmoid(jax.random.normal(kf3, (T3, B3, H3), dtype=jnp.float32))
    x3 = jax.random.normal(kx3, (T3, B3, H3), dtype=jnp.float32)
    h03 = jax.random.normal(kh3, (B3, H3), dtype=jnp.float32)

    out3 = jax.block_until_ready(fm(f3, x3, h03))
    ref3 = jax.block_until_ready(forget_mult_ref(f3, x3, h03))
    assert np.allclose(np.asarray(out3), np.asarray(ref3), rtol=1e-5, atol=1e-5), (
        np.abs(np.asarray(out3) - np.asarray(ref3)).max())

    print("KERNEL_OK")
</pallas_src>

<mosaic_0001>
module attributes {stable_mosaic.version = 11 : i64} {
  func.func @kernel(%arg0: i32, %arg1: i32, %arg2: memref<8x1x128xf32, #tpu.memory_space<vmem>>, %arg3: memref<8x1x128xf32, #tpu.memory_space<vmem>>, %arg4: memref<8x1x128xf32, #tpu.memory_space<vmem>>, %arg5: memref<1x128xf32, #tpu.memory_space<vmem>>) attributes {dimension_semantics = [#tpu.dimension_semantics<parallel>, #tpu.dimension_semantics<arbitrary>], iteration_bounds = array<i64: 1, 1>, scalar_prefetch = 0 : i64, scratch_operands = 1 : i64, tpu.core_type = #tpu.core_type<tc>, window_params = [{transform_indices = @transform_0, window_bounds = array<i64: 8, 1, 128>}, {transform_indices = @transform_1, window_bounds = array<i64: 8, 1, 128>}, {transform_indices = @transform_2, window_bounds = array<i64: 8, 1, 128>}]} {
    %c0_i32 = arith.constant 0 : i32
    %0 = arith.cmpi eq, %arg1, %c0_i32 : i32
    %1 = arith.extui %0 : i1 to i32
    %c0_i32_0 = arith.constant 0 : i32
    %2 = arith.cmpi ne, %1, %c0_i32_0 : i32
    scf.if %2 {
      %cst_60 = arith.constant 0.000000e+00 : f32
      %125 = vector.broadcast %cst_60 : f32 to vector<1x128xf32>
      %c0_61 = arith.constant 0 : index
      %c0_62 = arith.constant 0 : index
      %126 = vector.load %arg5[%c0_61, %c0_62] : memref<1x128xf32, #tpu.memory_space<vmem>>, vector<1x128xf32>
      tpu.vector_store %arg5[%c0_61, %c0_62], %125 {strides = array<i32>} : memref<1x128xf32, #tpu.memory_space<vmem>>, vector<1x128xf32>,
    } else {
    }
    %c0 = arith.constant 0 : index
    %c0_1 = arith.constant 0 : index
    %3 = vector.load %arg5[%c0, %c0_1] : memref<1x128xf32, #tpu.memory_space<vmem>>, vector<1x128xf32>
    %c0_i32_2 = arith.constant 0 : i32
    %4 = arith.index_cast %c0_i32_2 : i32 to index
    %c0_3 = arith.constant 0 : index
    %c0_4 = arith.constant 0 : index
    %5 = vector.load %arg2[%4, %c0_3, %c0_4] : memref<8x1x128xf32, #tpu.memory_space<vmem>>, vector<1x1x128xf32>
    %6 = vector.shape_cast %5 : vector<1x1x128xf32> to vector<1x128xf32>
    %7 = arith.index_cast %c0_i32_2 : i32 to index
    %c0_5 = arith.constant 0 : index
    %c0_6 = arith.constant 0 : index
    %8 = vector.load %arg3[%7, %c0_5, %c0_6] : memref<8x1x128xf32, #tpu.memory_space<vmem>>, vector<1x1x128xf32>
    %9 = vector.shape_cast %8 : vector<1x1x128xf32> to vector<1x128xf32>
    %10 = arith.mulf %6, %9 : vector<1x128xf32>
    %cst = arith.constant 1.000000e+00 : f32
    %11 = vector.broadcast %cst : f32 to vector<1x128xf32>
    %12 = arith.subf %11, %6 : vector<1x128xf32>
    %13 = arith.mulf %12, %3 : vector<1x128xf32>
    %14 = arith.addf %10, %13 : vector<1x128xf32>
    %15 = arith.index_cast %c0_i32_2 : i32 to index
    %c0_7 = arith.constant 0 : index
    %c0_8 = arith.constant 0 : index
    %16 = vector.load %arg4[%15, %c0_7, %c0_8] : memref<8x1x128xf32, #tpu.memory_space<vmem>>, vector<1x1x128xf32>
    %17 = vector.shape_cast %16 : vector<1x1x128xf32> to vector<1x128xf32>
    %18 = vector.shape_cast %14 : vector<1x128xf32> to vector<1x1x128xf32>
    tpu.vector_store %arg4[%15, %c0_7, %c0_8], %18 {strides = array<i32>} : memref<8x1x128xf32, #tpu.memory_space<vmem>>, vector<1x1x128xf32>,
    %c1_i32 = arith.constant 1 : i32
    %19 = arith.index_cast %c1_i32 : i32 to index
    %c0_9 = arith.constant 0 : index
    %c0_10 = arith.constant 0 : index
    %20 = vector.load %arg2[%19, %c0_9, %c0_10] : memref<8x1x128xf32, #tpu.memory_space<vmem>>, vector<1x1x128xf32>
    %21 = vector.shape_cast %20 : vector<1x1x128xf32> to vector<1x128xf32>
    %22 = arith.index_cast %c1_i32 : i32 to index
    %c0_11 = arith.constant 0 : index
    %c0_12 = arith.constant 0 : index
    %23 = vector.load %arg3[%22, %c0_11, %c0_12] : memref<8x1x128xf32, #tpu.memory_space<vmem>>, vector<1x1x128xf32>
    %24 = vector.shape_cast %23 : vector<1x1x128xf32> to vector<1x128xf32>
    %25 = arith.mulf %21, %24 : vector<1x128xf32>
    %cst_13 = arith.constant 1.000000e+00 : f32
    %26 = vector.broadcast %cst_13 : f32 to vector<1x128xf32>
    %27 = arith.subf %26, %21 : vector<1x128xf32>
    %28 = arith.mulf %27, %14 : vector<1x128xf32>
    %29 = arith.addf %25, %28 : vector<1x128xf32>
    %30 = arith.index_cast %c1_i32 : i32 to index
    %c0_14 = arith.constant 0 : index
    %c0_15 = arith.constant 0 : index
    %31 = vector.load %arg4[%30, %c0_14, %c0_15] : memref<8x1x128xf32, #tpu.memory_space<vmem>>, vector<1x1x128xf32>
    %32 = vector.shape_cast %31 : vector<1x1x128xf32> to vector<1x128xf32>
    %33 = vector.shape_cast %29 : vector<1x128xf32> to vector<1x1x128xf32>
    tpu.vector_store %arg4[%30, %c0_14, %c0_15], %33 {strides = array<i32>} : memref<8x1x128xf32, #tpu.memory_space<vmem>>, vector<1x1x128xf32>,
    %c2_i32 = arith.constant 2 : i32
    %34 = arith.index_cast %c2_i32 : i32 to index
    %c0_16 = arith.constant 0 : index
    %c0_17 = arith.constant 0 : index
    %35 = vector.load %arg2[%34, %c0_16, %c0_17] : memref<8x1x128xf32, #tpu.memory_space<vmem>>, vector<1x1x128xf32>
    %36 = vector.shape_cast %35 : vector<1x1x128xf32> to vector<1x128xf32>
    %37 = arith.index_cast %c2_i32 : i32 to index
    %c0_18 = arith.constant 0 : index
    %c0_19 = arith.constant 0 : index
    %38 = vector.load %arg3[%37, %c0_18, %c0_19] : memref<8x1x128xf32, #tpu.memory_space<vmem>>, vector<1x1x128xf32>
    %39 = vector.shape_cast %38 : vector<1x1x128xf32> to vector<1x128xf32>
    %40 = arith.mulf %36, %39 : vector<1x128xf32>
    %cst_20 = arith.constant 1.000000e+00 : f32
    %41 = vector.broadcast %cst_20 : f32 to vector<1x128xf32>
    %42 = arith.subf %41, %36 : vector<1x128xf32>
    %43 = arith.mulf %42, %29 : vector<1x128xf32>
    %44 = arith.addf %40, %43 : vector<1x128xf32>
    %45 = arith.index_cast %c2_i32 : i32 to index
    %c0_21 = arith.constant 0 : index
    %c0_22 = arith.constant 0 : index
    %46 = vector.load %arg4[%45, %c0_21, %c0_22] : memref<8x1x128xf32, #tpu.memory_space<vmem>>, vector<1x1x128xf32>
    %47 = vector.shape_cast %46 : vector<1x1x128xf32> to vector<1x128xf32>
    %48 = vector.shape_cast %44 : vector<1x128xf32> to vector<1x1x128xf32>
    tpu.vector_store %arg4[%45, %c0_21, %c0_22], %48 {strides = array<i32>} : memref<8x1x128xf32, #tpu.memory_space<vmem>>, vector<1x1x128xf32>,
    %c3_i32 = arith.constant 3 : i32
    %49 = arith.index_cast %c3_i32 : i32 to index
    %c0_23 = arith.constant 0 : index
    %c0_24 = arith.constant 0 : index
    %50 = vector.load %arg2[%49, %c0_23, %c0_24] : memref<8x1x128xf32, #tpu.memory_space<vmem>>, vector<1x1x128xf32>
    %51 = vector.shape_cast %50 : vector<1x1x128xf32> to vector<1x128xf32>
    %52 = arith.index_cast %c3_i32 : i32 to index
    %c0_25 = arith.constant 0 : index
    %c0_26 = arith.constant 0 : index
    %53 = vector.load %arg3[%52, %c0_25, %c0_26] : memref<8x1x128xf32, #tpu.memory_space<vmem>>, vector<1x1x128xf32>
    %54 = vector.shape_cast %53 : vector<1x1x128xf32> to vector<1x128xf32>
    %55 = arith.mulf %51, %54 : vector<1x128xf32>
    %cst_27 = arith.constant 1.000000e+00 : f32
    %56 = vector.broadcast %cst_27 : f32 to vector<1x128xf32>
    %57 = arith.subf %56, %51 : vector<1x128xf32>
    %58 = arith.mulf %57, %44 : vector<1x128xf32>
    %59 = arith.addf %55, %58 : vector<1x128xf32>
    %60 = arith.index_cast %c3_i32 : i32 to index
    %c0_28 = arith.constant 0 : index
    %c0_29 = arith.constant 0 : index
    %61 = vector.load %arg4[%60, %c0_28, %c0_29] : memref<8x1x128xf32, #tpu.memory_space<vmem>>, vector<1x1x128xf32>
    %62 = vector.shape_cast %61 : vector<1x1x128xf32> to vector<1x128xf32>
    %63 = vector.shape_cast %59 : vector<1x128xf32> to vector<1x1x128xf32>
    tpu.vector_store %arg4[%60, %c0_28, %c0_29], %63 {strides = array<i32>} : memref<8x1x128xf32, #tpu.memory_space<vmem>>, vector<1x1x128xf32>,
    %c4_i32 = arith.constant 4 : i32
    %64 = arith.index_cast %c4_i32 : i32 to index
    %c0_30 = arith.constant 0 : index
    %c0_31 = arith.constant 0 : index
    %65 = vector.load %arg2[%64, %c0_30, %c0_31] : memref<8x1x128xf32, #tpu.memory_space<vmem>>, vector<1x1x128xf32>
    %66 = vector.shape_cast %65 : vector<1x1x128xf32> to vector<1x128xf32>
    %67 = arith.index_cast %c4_i32 : i32 to index
    %c0_32 = arith.constant 0 : index
    %c0_33 = arith.constant 0 : index
    %68 = vector.load %arg3[%67, %c0_32, %c0_33] : memref<8x1x128xf32, #tpu.memory_space<vmem>>, vector<1x1x128xf32>
    %69 = vector.shape_cast %68 : vector<1x1x128xf32> to vector<1x128xf32>
    %70 = arith.mulf %66, %69 : vector<1x128xf32>
    %cst_34 = arith.constant 1.000000e+00 : f32
    %71 = vector.broadcast %cst_34 : f32 to vector<1x128xf32>
    %72 = arith.subf %71, %66 : vector<1x128xf32>
    %73 = arith.mulf %72, %59 : vector<1x128xf32>
    %74 = arith.addf %70, %73 : vector<1x128xf32>
    %75 = arith.index_cast %c4_i32 : i32 to index
    %c0_35 = arith.constant 0 : index
    %c0_36 = arith.constant 0 : index
    %76 = vector.load %arg4[%75, %c0_35, %c0_36] : memref<8x1x128xf32, #tpu.memory_space<vmem>>, vector<1x1x128xf32>
    %77 = vector.shape_cast %76 : vector<1x1x128xf32> to vector<1x128xf32>
    %78 = vector.shape_cast %74 : vector<1x128xf32> to vector<1x1x128xf32>
    tpu.vector_store %arg4[%75, %c0_35, %c0_36], %78 {strides = array<i32>} : memref<8x1x128xf32, #tpu.memory_space<vmem>>, vector<1x1x128xf32>,
    %c5_i32 = arith.constant 5 : i32
    %79 = arith.index_cast %c5_i32 : i32 to index
    %c0_37 = arith.constant 0 : index
    %c0_38 = arith.constant 0 : index
    %80 = vector.load %arg2[%79, %c0_37, %c0_38] : memref<8x1x128xf32, #tpu.memory_space<vmem>>, vector<1x1x128xf32>
    %81 = vector.shape_cast %80 : vector<1x1x128xf32> to vector<1x128xf32>
    %82 = arith.index_cast %c5_i32 : i32 to index
    %c0_39 = arith.constant 0 : index
    %c0_40 = arith.constant 0 : index
    %83 = vector.load %arg3[%82, %c0_39, %c0_40] : memref<8x1x128xf32, #tpu.memory_space<vmem>>, vector<1x1x128xf32>
    %84 = vector.shape_cast %83 : vector<1x1x128xf32> to vector<1x128xf32>
    %85 = arith.mulf %81, %84 : vector<1x128xf32>
    %cst_41 = arith.constant 1.000000e+00 : f32
    %86 = vector.broadcast %cst_41 : f32 to vector<1x128xf32>
    %87 = arith.subf %86, %81 : vector<1x128xf32>
    %88 = arith.mulf %87, %74 : vector<1x128xf32>
    %89 = arith.addf %85, %88 : vector<1x128xf32>
    %90 = arith.index_cast %c5_i32 : i32 to index
    %c0_42 = arith.constant 0 : index
    %c0_43 = arith.constant 0 : index
    %91 = vector.load %arg4[%90, %c0_42, %c0_43] : memref<8x1x128xf32, #tpu.memory_space<vmem>>, vector<1x1x128xf32>
    %92 = vector.shape_cast %91 : vector<1x1x128xf32> to vector<1x128xf32>
    %93 = vector.shape_cast %89 : vector<1x128xf32> to vector<1x1x128xf32>
    tpu.vector_store %arg4[%90, %c0_42, %c0_43], %93 {strides = array<i32>} : memref<8x1x128xf32, #tpu.memory_space<vmem>>, vector<1x1x128xf32>,
    %c6_i32 = arith.constant 6 : i32
    %94 = arith.index_cast %c6_i32 : i32 to index
    %c0_44 = arith.constant 0 : index
    %c0_45 = arith.constant 0 : index
    %95 = vector.load %arg2[%94, %c0_44, %c0_45] : memref<8x1x128xf32, #tpu.memory_space<vmem>>, vector<1x1x128xf32>
    %96 = vector.shape_cast %95 : vector<1x1x128xf32> to vector<1x128xf32>
    %97 = arith.index_cast %c6_i32 : i32 to index
    %c0_46 = arith.constant 0 : index
    %c0_47 = arith.constant 0 : index
    %98 = vector.load %arg3[%97, %c0_46, %c0_47] : memref<8x1x128xf32, #tpu.memory_space<vmem>>, vector<1x1x128xf32>
    %99 = vector.shape_cast %98 : vector<1x1x128xf32> to vector<1x128xf32>
    %100 = arith.mulf %96, %99 : vector<1x128xf32>
    %cst_48 = arith.constant 1.000000e+00 : f32
    %101 = vector.broadcast %cst_48 : f32 to vector<1x128xf32>
    %102 = arith.subf %101, %96 : vector<1x128xf32>
    %103 = arith.mulf %102, %89 : vector<1x128xf32>
    %104 = arith.addf %100, %103 : vector<1x128xf32>
    %105 = arith.index_cast %c6_i32 : i32 to index
    %c0_49 = arith.constant 0 : index
    %c0_50 = arith.constant 0 : index
    %106 = vector.load %arg4[%105, %c0_49, %c0_50] : memref<8x1x128xf32, #tpu.memory_space<vmem>>, vector<1x1x128xf32>
    %107 = vector.shape_cast %106 : vector<1x1x128xf32> to vector<1x128xf32>
    %108 = vector.shape_cast %104 : vector<1x128xf32> to vector<1x1x128xf32>
    tpu.vector_store %arg4[%105, %c0_49, %c0_50], %108 {strides = array<i32>} : memref<8x1x128xf32, #tpu.memory_space<vmem>>, vector<1x1x128xf32>,
    %c7_i32 = arith.constant 7 : i32
    %109 = arith.index_cast %c7_i32 : i32 to index
    %c0_51 = arith.constant 0 : index
    %c0_52 = arith.constant 0 : index
    %110 = vector.load %arg2[%109, %c0_51, %c0_52] : memref<8x1x128xf32, #tpu.memory_space<vmem>>, vector<1x1x128xf32>
    %111 = vector.shape_cast %110 : vector<1x1x128xf32> to vector<1x128xf32>
    %112 = arith.index_cast %c7_i32 : i32 to index
    %c0_53 = arith.constant 0 : index
    %c0_54 = arith.constant 0 : index
    %113 = vector.load %arg3[%112, %c0_53, %c0_54] : memref<8x1x128xf32, #tpu.memory_space<vmem>>, vector<1x1x128xf32>
    %114 = vector.shape_cast %113 : vector<1x1x128xf32> to vector<1x128xf32>
    %115 = arith.mulf %111, %114 : vector<1x128xf32>
    %cst_55 = arith.constant 1.000000e+00 : f32
    %116 = vector.broadcast %cst_55 : f32 to vector<1x128xf32>
    %117 = arith.subf %116, %111 : vector<1x128xf32>
    %118 = arith.mulf %117, %104 : vector<1x128xf32>
    %119 = arith.addf %115, %118 : vector<1x128xf32>
    %120 = arith.index_cast %c7_i32 : i32 to index
    %c0_56 = arith.constant 0 : index
    %c0_57 = arith.constant 0 : index
    %121 = vector.load %arg4[%120, %c0_56, %c0_57] : memref<8x1x128xf32, #tpu.memory_space<vmem>>, vector<1x1x128xf32>
    %122 = vector.shape_cast %121 : vector<1x1x128xf32> to vector<1x128xf32>
    %123 = vector.shape_cast %119 : vector<1x128xf32> to vector<1x1x128xf32>
    tpu.vector_store %arg4[%120, %c0_56, %c0_57], %123 {strides = array<i32>} : memref<8x1x128xf32, #tpu.memory_space<vmem>>, vector<1x1x128xf32>,
    %c8_i32 = arith.constant 8 : i32
    %c0_58 = arith.constant 0 : index
    %c0_59 = arith.constant 0 : index
    %124 = vector.load %arg5[%c0_58, %c0_59] : memref<1x128xf32, #tpu.memory_space<vmem>>, vector<1x128xf32>
    tpu.vector_store %arg5[%c0_58, %c0_59], %119 {strides = array<i32>} : memref<1x128xf32, #tpu.memory_space<vmem>>, vector<1x128xf32>,
    return
  }
  func.func @transform_0(%arg0: i32, %arg1: i32) -> (i32, i32, i32) {
    %c0_i32 = arith.constant 0 : i32
    %c0_i32_0 = arith.constant 0 : i32
    return %arg1, %arg0, %c0_i32 : i32, i32, i32
  }
  func.func @transform_1(%arg0: i32, %arg1: i32) -> (i32, i32, i32) {
    %c0_i32 = arith.constant 0 : i32
    %c0_i32_0 = arith.constant 0 : i32
    return %arg1, %arg0, %c0_i32 : i32, i32, i32
  }
  func.func @transform_2(%arg0: i32, %arg1: i32) -> (i32, i32, i32) {
    %c0_i32 = arith.constant 0 : i32
    %c0_i32_0 = arith.constant 0 : i32
    return %arg1, %arg0, %c0_i32 : i32, i32, i32
  }
}

</mosaic_0001>

<bundles_post_ra>
// kernel: tpu_custom_call.1
= control target key start
LH: loop header
LB: loop body
LE: loop exit
PB: predicated region body
PF: predicated region fallthrough
CT: control target
= control target key end

     0   :  { %7 = vsyncpa [#allocation4], 0  ;;  %s286_s0 = inlined_call_operand.hbm [shape: f32[8,1,128], index: 0, kind: input, shape index: {}]   ;;  %s287_s1 = inlined_call_operand.hbm [shape: f32[8,1,128], index: 1, kind: input, shape index: {}]   ;;  %s288_s2 = inlined_call_operand.hbm [shape: f32[8,1,128], index: 2, kind: output, shape index: {}]  }
   0x1   :  { %8 = vsyncpa [#allocation7], 0 }
   0x2   :  { %9 = vsyncpa [#allocation5], 0  ;;  %s220_s9 = smov [#allocation3]   ;;  %s148_s13 = scalar_lea.hbm %s286_s0, 128 }
   0x3   :  { %s15_s10 = sshll.u32 %s220_s9, 4  ;;  %p149_p0 = scmp.ne.s32.totalorder %s286_s0, %s148_s13  ;;  %s16_s10 = int_to_ptr.vmem [resolvable:$true] %s15_s10 }
   0x4   :  { %p152_p1 = scmp.lt.u32.totalorder %s148_s13, %s286_s0 }
   0x6   :  { %p154_p2 = pnand %p152_p1, %p149_p0 }
   0x8   :  { %157 = shalt.err (!%p154_p2)
}
   0x9   :  { %s158_s18 = scalar_lea.vmem %s16_s10, 128  ;;  %p163_p4 = scmp.lt.s32.totalorder %s16_s10, %s16_s10 }
   0xa   :  { %p159_p3 = scmp.ne.s32.totalorder %s16_s10, %s158_s18  ;;  %p164_p5 = scmp.lt.s32.totalorder %s158_s18, %s158_s18 }
   0xc   :  { %p165_p6 = por %p164_p5, %p163_p4 }
   0xe   :  { %p166_p7 = pnand %p165_p6, %p159_p3 }
  0x10   :  { %169 = shalt.err (!%p166_p7)
}
  0x11   :  { %s221_s19 = smov 16   ;;  %s222_s20 = smov 1  }
  0x12   :  { %21 = dma.hbm_to_vmem [thread:$0]  %s286_s0, 128, %s16_s10, [#allocation4], %s221_s19, %s221_s19, %s222_s20  }
  0x13   :  { %s223_s23 = smov [#allocation6]   ;;  %s170_s27 = scalar_lea.hbm %s287_s1, 128 }
  0x14   :  { %s27_s24 = sshll.u32 %s223_s23, 4  ;;  %p171_p8 = scmp.ne.s32.totalorder %s287_s1, %s170_s27  ;;  %s28_s24 = int_to_ptr.vmem [resolvable:$true] %s27_s24 }
  0x15   :  { %p174_p9 = scmp.lt.u32.totalorder %s170_s27, %s287_s1 }
  0x17   :  { %p176_p10 = pnand %p174_p9, %p171_p8 }
  0x19   :  { %179 = shalt.err (!%p176_p10)
}
  0x1a   :  { %s180_s4 = scalar_lea.vmem %s28_s24, 128  ;;  %p185_p12 = scmp.lt.s32.totalorder %s28_s24, %s28_s24 }
  0x1b   :  { %p181_p11 = scmp.ne.s32.totalorder %s28_s24, %s180_s4  ;;  %p186_p13 = scmp.lt.s32.totalorder %s180_s4, %s180_s4 }
  0x1d   :  { %p187_p0 = por %p186_p13, %p185_p12 }
  0x1f   :  { %p188_p1 = pnand %p187_p0, %p181_p11 }
  0x21   :  { %191 = shalt.err (!%p188_p1)
}
  0x22   :  { %33 = dma.hbm_to_vmem [thread:$0]  %s287_s1, 128, %s28_s24, [#allocation7], %s221_s19, %s221_s19, %s222_s20  }
  0x23   :  { %214 = dma.done.wait [#allocation4], 128  }
  0x24   :  { %215 = vsyncadd [#allocation4], 4294967168 }
  0x25   :  { %216 = dma.done.wait [#allocation7], 128  }
  0x26   :  { %217 = vsyncadd [#allocation7], 4294967168  ;;  %v224_v0 = vmov 0.0   ;;  %v46_v1 = vld [vmem:[#allocation3] sm:$0x1]  ;;  %s225_s1 = smov [#allocation8]  }
  0x27   :  { %44 = vst [vmem:[#allocation2] sm:$0x1] %v224_v0  ;;  %v47_v2 = vld [vmem:[#allocation6] sm:$0x1]  ;;  %v54_v3 = vld [vmem:[#allocation3 + $0x1] sm:$0x1] }
  0x28   :  { %v48_v5 = vmul.f32 %v47_v2, %v46_v1  ;;  %v49_v6 = vsub.f32 1.0, %v46_v1  ;;  %v56_v7 = vld [vmem:[#allocation6 + $0x1] sm:$0x1]  ;;  %v58_v9 = vsub.f32 1.0, %v54_v3  ;;  %v64_v10 = vld [vmem:[#allocation3 + $0x2] sm:$0x1] }
  0x29   :  { %v57_v12 = vmul.f32 %v56_v7, %v54_v3  ;;  %v66_v13 = vld [vmem:[#allocation6 + $0x2] sm:$0x1]  ;;  %v68_v15 = vsub.f32 1.0, %v64_v10  ;;  %v74_v16 = vld [vmem:[#allocation3 + $0x3] sm:$0x1]  ;;  %s129_s6 = sshll.u32 %s225_s1, 4  ;;  %s130_s6 = int_to_ptr.vmem [resolvable:$true] %s129_s6 }
  0x2a   :  { %v67_v18 = vmul.f32 %v66_v13, %v64_v10  ;;  %v76_v19 = vld [vmem:[#allocation6 + $0x3] sm:$0x1]  ;;  %v78_v21 = vsub.f32 1.0, %v74_v16  ;;  %v84_v22 = vld [vmem:[#allocation3 + $0x4] sm:$0x1]  ;;  %s192_s7 = scalar_lea.vmem %s130_s6, 128  ;;  %p197_p3 = scmp.lt.s32.totalorder %s130_s6, %s130_s6 }
  0x2b   :  { %v77_v24 = vmul.f32 %v76_v19, %v74_v16  ;;  %v86_v25 = vld [vmem:[#allocation6 + $0x4] sm:$0x1]  ;;  %v88_v27 = vsub.f32 1.0, %v84_v22  ;;  %v94_v28 = vld [vmem:[#allocation3 + $0x5] sm:$0x1]  ;;  %p193_p2 = scmp.ne.s32.totalorder %s130_s6, %s192_s7  ;;  %p198_p4 = scmp.lt.s32.totalorder %s192_s7, %s192_s7 }
  0x2c   :  { %v87_v30 = vmul.f32 %v86_v25, %v84_v22  ;;  %v96_v31 = vld [vmem:[#allocation6 + $0x5] sm:$0x1]  ;;  %v98_v33 = vsub.f32 1.0, %v94_v28  ;;  %v104_v34 = vld [vmem:[#allocation3 + $0x6] sm:$0x1] }
  0x2d   :  { %v97_v36 = vmul.f32 %v96_v31, %v94_v28  ;;  %v106_v37 = vld [vmem:[#allocation6 + $0x6] sm:$0x1]  ;;  %v108_v39 = vsub.f32 1.0, %v104_v34  ;;  %v114_v40 = vld [vmem:[#allocation3 + $0x7] sm:$0x1]  ;;  %p199_p5 = por %p198_p4, %p197_p3 }
  0x2e   :  { %v45_v4 = vld [vmem:[#allocation2] sm:$0x1]  ;;  %v107_v42 = vmul.f32 %v106_v37, %v104_v34  ;;  %v116_v43 = vld [vmem:[#allocation6 + $0x7] sm:$0x1]  ;;  %v118_v45 = vsub.f32 1.0, %v114_v40 }
  0x2f   :  { %v50_v8 = vmul.f32 %v49_v6, %v45_v4  ;;  %v117_v47 = vmul.f32 %v116_v43, %v114_v40  ;;  %p200_p6 = pnand %p199_p5, %p193_p2 }
  0x31   :  { %v51_v11 = vadd.f32 %v50_v8, %v48_v5 }
  0x33   :  { %52 = vst [vmem:[#allocation8] sm:$0x1] %v51_v11  ;;  %v59_v14 = vmul.f32 %v58_v9, %v51_v11 }
  0x35   :  { %v60_v17 = vadd.f32 %v59_v14, %v57_v12 }
  0x37   :  { %62 = vst [vmem:[#allocation8 + $0x1] sm:$0x1] %v60_v17  ;;  %v69_v20 = vmul.f32 %v68_v15, %v60_v17 }
  0x39   :  { %v70_v23 = vadd.f32 %v69_v20, %v67_v18 }
  0x3b   :  { %72 = vst [vmem:[#allocation8 + $0x2] sm:$0x1] %v70_v23  ;;  %v79_v26 = vmul.f32 %v78_v21, %v70_v23 }
  0x3d   :  { %v80_v29 = vadd.f32 %v79_v26, %v77_v24 }
  0x3f   :  { %82 = vst [vmem:[#allocation8 + $0x3] sm:$0x1] %v80_v29  ;;  %v89_v32 = vmul.f32 %v88_v27, %v80_v29 }
  0x41   :  { %v90_v35 = vadd.f32 %v89_v32, %v87_v30 }
  0x43   :  { %92 = vst [vmem:[#allocation8 + $0x4] sm:$0x1] %v90_v35  ;;  %v99_v38 = vmul.f32 %v98_v33, %v90_v35 }
  0x45   :  { %v100_v41 = vadd.f32 %v99_v38, %v97_v36 }
  0x47   :  { %102 = vst [vmem:[#allocation8 + $0x5] sm:$0x1] %v100_v41  ;;  %v109_v44 = vmul.f32 %v108_v39, %v100_v41 }
  0x49   :  { %v110_v46 = vadd.f32 %v109_v44, %v107_v42 }
  0x4b   :  { %112 = vst [vmem:[#allocation8 + $0x6] sm:$0x1] %v110_v46  ;;  %v119_v48 = vmul.f32 %v118_v45, %v110_v46 }
  0x4d   :  { %v120_v49 = vadd.f32 %v119_v48, %v117_v47 }
  0x4f   :  { %122 = vst [vmem:[#allocation8 + $0x7] sm:$0x1] %v120_v49  ;;  %123 = vst [vmem:[#allocation2] sm:$0x1] %v120_v49 }
  0x50   :  { %203 = shalt.err (!%p200_p6)
}
  0x51   :  { %s204_s10 = scalar_lea.hbm %s288_s2, 128 }
  0x52   :  { %p205_p7 = scmp.ne.s32.totalorder %s288_s2, %s204_s10  ;;  %p208_p8 = scmp.lt.u32.totalorder %s204_s10, %s288_s2 }
  0x54   :  { %p210_p9 = pnand %p208_p8, %p205_p7 }
  0x56   :  { %213 = shalt.err (!%p210_p9)
}
  0x57   :  { %135 = dma.vmem_to_hbm [thread:$0]  %s130_s6, 128, %s288_s2, [#allocation5], %s221_s19, %s221_s19, %s222_s20  }
  0x58   :  { %218 = dma.done.wait [#allocation5], 128  }
  0x59   :  { %219 = vsyncadd [#allocation5], 4294967168 }
  0x5a   :  { %139 = vsyncpa [#allocation4], 1 }
  0x5b   :  { %140 = vsyncpa [#allocation7], 1 }
  0x5c   :  { %141 = vsyncpa [#allocation5], 1 }

</bundles_post_ra>
